<compile_context>
chip_gen: v5e
topology: v5e:2x2
jax: 0.10.0
libtpu: 0.0.40
codegen_flags: <defaults>
</compile_context>

<pallas_src>
import math
import functools

import jax
import jax.numpy as jnp
from jax.experimental import pallas as pl
from jax.experimental.pallas import tpu as pltpu  # noqa: F401  (TPU backend assumed)

# ---------------- model hyper-parameters (small, consistent with the module) ----
B = 2          # batch
T = 8          # sequence length (power of two -> cheap mask arithmetic)
C = 32         # embedding_dim
N_HEADS = 4    # n_heads
D_FF = 64      # d_ff
LN_EPS = 1e-5  # F.layer_norm default eps
LANE = 128     # TPU lane width


def _layer_norm(v, w, b):
    # v: (R, C), w/b: (1, C); biased variance, matching F.layer_norm
    mu = jnp.mean(v, axis=-1, keepdims=True)
    var = jnp.mean((v - mu) ** 2, axis=-1, keepdims=True)
    return (v - mu) * jax.lax.rsqrt(var + LN_EPS) * w + b


def decoder_kernel(x_ref,
                   ln1w_ref, ln1b_ref,
                   wqkv_ref, bqkv_ref,
                   wo_ref, bo_ref,
                   ln2w_ref, ln2b_ref,
                   w1_ref, b1_ref,
                   w2_ref, b2_ref,
                   out_ref,
                   *, n_heads, seq_len, lane_pack):
    x = x_ref[...]                                  # (R, C) f32, R = B*T (batch folded in)
    r_rows, c = x.shape
    hd = c // n_heads
    scale = 1.0 / math.sqrt(hd)

    # ---------------- x = x + Attention(LN1(x)) ----------------
    h = _layer_norm(x, ln1w_ref[...], ln1b_ref[...])
    qkv = jnp.dot(h.astype(jnp.bfloat16), wqkv_ref[...],
                  preferred_element_type=jnp.float32) + bqkv_ref[...]      # (R, 3C) f32

    # Stack heads along sublanes (head-major): stacked row = head * R + (b*T + t).
    qs = jnp.concatenate(
        [qkv[:, hh * hd:(hh + 1) * hd] for hh in range(n_heads)], axis=0)          # (H*R, hd)
    ks = jnp.concatenate(
        [qkv[:, c + hh * hd:c + (hh + 1) * hd] for hh in range(n_heads)], axis=0)   # (H*R, hd)
    vs = jnp.concatenate(
        [qkv[:, 2 * c + hh * hd:2 * c + (hh + 1) * hd] for hh in range(n_heads)],
        axis=0)                                                                      # (H*R, hd)

    # One matmul for all heads & batches: contract over hd (no transpose needed).
    s = jax.lax.dot_general(qs * scale, ks, (((1,), (1,)), ((), ())),
                            preferred_element_type=jnp.float32)             # (H*R, H*R)

    # Combined head/batch/causal mask: rows group into blocks of T per (head, batch);
    # within a group causality is just col <= row.
    hr = n_heads * r_rows
    log2t = seq_len.bit_length() - 1                # seq_len is a power of two
    row_i = jax.lax.broadcasted_iota(jnp.int32, (hr, hr), 0)
    col_i = jax.lax.broadcasted_iota(jnp.int32, (hr, hr), 1)
    same_grp = jnp.right_shift(row_i, log2t) == jnp.right_shift(col_i, log2t)
    mask = jnp.logical_and(same_grp, col_i <= row_i)

    # Hand-rolled softmax (row max -> exp -> sum -> EUP reciprocal).
    s = jnp.where(mask, s, -1e30)
    m = jnp.max(s, axis=-1, keepdims=True)
    e = jnp.where(mask, jnp.exp(s - m), 0.0)
    l = jnp.sum(e, axis=-1, keepdims=True)
    p = e * pl.reciprocal(l, approx=True)

    attn = jnp.dot(p, vs, preferred_element_type=jnp.float32)               # (H*R, hd)
    # Un-stack heads back to (R, C): column block hh comes from stacked rows [hh*R, (hh+1)*R).
    y = jnp.concatenate(
        [attn[hh * r_rows:(hh + 1) * r_rows, :] for hh in range(n_heads)], axis=1)   # (R, C)
    y = jnp.dot(y.astype(jnp.bfloat16), wo_ref[...],
                preferred_element_type=jnp.float32) + bo_ref[...]
    x = x + y

    # ---------------- x = x + FFN(LN2(x)) ----------------
    h2 = _layer_norm(x, ln2w_ref[...], ln2b_ref[...])
    f = jnp.dot(h2.astype(jnp.bfloat16), w1_ref[...],
                preferred_element_type=jnp.float32) + b1_ref[...]
    f = jnp.maximum(f, 0.0)
    f = jnp.dot(f.astype(jnp.bfloat16), w2_ref[...],
                preferred_element_type=jnp.float32) + b2_ref[...]
    x = x + f

    if lane_pack:
        # Lane-dense output slab: slab[j, mm*C:(mm+1)*C] = x[mm*srows + j]  (un-permuted outside).
        g = LANE // c
        srows = r_rows // g
        out_ref[...] = jnp.concatenate(
            [x[mm * srows:(mm + 1) * srows, :] for mm in range(g)], axis=1)  # (srows, 128)
    else:
        out_ref[...] = x


def decoder_forward(x, params):
    """x: (B, T, C) float32; params: dict of weights (see init_params)."""
    b, t, c = x.shape
    assert c % N_HEADS == 0
    assert (t & (t - 1)) == 0, "seq_len must be a power of two for the cheap mask arithmetic"
    r = b * t

    lane_pack = (c <= LANE) and (LANE % c == 0) and (r % (LANE // c) == 0)
    if lane_pack:
        g = LANE // c
        srows = r // g
        out_shape = jax.ShapeDtypeStruct((srows, g * c), jnp.float32)
    else:
        out_shape = jax.ShapeDtypeStruct((r, c), jnp.float32)

    kernel = functools.partial(decoder_kernel, n_heads=N_HEADS, seq_len=t, lane_pack=lane_pack)

    param_list = [
        params["ln1_w"], params["ln1_b"],
        params["w_qkv"], params["b_qkv"],
        params["w_o"], params["b_o"],
        params["ln2_w"], params["ln2_b"],
        params["w_ff1"], params["b_ff1"],
        params["w_ff2"], params["b_ff2"],
    ]

    # No grid: one invocation, every (tiny) operand fully resident in VMEM.
    # For large B, switch back to grid=(B,) with dimension_semantics=("parallel",) so that
    # v7x's two TensorCores each take a slice of the batch.
    slab = pl.pallas_call(kernel, out_shape=out_shape)(x.reshape(r, c), *param_list)

    if lane_pack:
        out = slab.reshape(srows, g, c).transpose(1, 0, 2).reshape(b, t, c)
    else:
        out = slab.reshape(b, t, c)
    return out


def init_params(key):
    """Deterministic synthetic init.  Linear weights stored (in, out); matmul weights in bf16."""
    ks = jax.random.split(key, 8)

    def lin(k, fan_in, fan_out):
        bound = 1.0 / math.sqrt(fan_in)
        kw, kb = jax.random.split(k)
        w = jax.random.uniform(kw, (fan_in, fan_out), jnp.float32, -bound, bound)
        bvec = jax.random.uniform(kb, (1, fan_out), jnp.float32, -bound, bound)
        return w.astype(jnp.bfloat16), bvec

    w_qkv, b_qkv = lin(ks[0], C, 3 * C)
    w_o, b_o = lin(ks[1], C, C)
    w_ff1, b_ff1 = lin(ks[2], C, D_FF)
    w_ff2, b_ff2 = lin(ks[3], D_FF, C)

    return {
        "ln1_w": jnp.ones((1, C), jnp.float32),
        "ln1_b": jnp.zeros((1, C), jnp.float32),
        "w_qkv": w_qkv, "b_qkv": b_qkv,
        "w_o": w_o, "b_o": b_o,
        "ln2_w": jnp.ones((1, C), jnp.float32),
        "ln2_b": jnp.zeros((1, C), jnp.float32),
        "w_ff1": w_ff1, "b_ff1": b_ff1,
        "w_ff2": w_ff2, "b_ff2": b_ff2,
    }


def decoder_reference(x, p):
    """Pure-JAX reference of the same forward pass (same bf16-weight / f32-accumulate recipe)."""
    def ln(v, w, b):
        mu = jnp.mean(v, axis=-1, keepdims=True)
        var = jnp.mean((v - mu) ** 2, axis=-1, keepdims=True)
        return (v - mu) * jax.lax.rsqrt(var + LN_EPS) * w + b

    h = ln(x, p["ln1_w"], p["ln1_b"])
    qkv = jnp.einsum("btc,cd->btd", h.astype(jnp.bfloat16), p["w_qkv"],
                     preferred_element_type=jnp.float32) + p["b_qkv"]
    q, k, v = jnp.split(qkv, 3, axis=-1)
    hd = C // N_HEADS

    def heads(z):  # (B, T, C) -> (B, H, T, hd)
        return z.reshape(B, T, N_HEADS, hd).transpose(0, 2, 1, 3)

    q, k, v = heads(q), heads(k), heads(v)
    s = jnp.einsum("bhqd,bhkd->bhqk", q, k) / math.sqrt(hd)
    mask = jnp.tril(jnp.ones((T, T), bool))
    s = jnp.where(mask, s, -jnp.inf)
    a = jax.nn.softmax(s, axis=-1)
    y = jnp.einsum("bhqk,bhkd->bhqd", a, v).transpose(0, 2, 1, 3).reshape(B, T, C)
    x = x + jnp.einsum("btc,cd->btd", y.astype(jnp.bfloat16), p["w_o"],
                       preferred_element_type=jnp.float32) + p["b_o"]

    h2 = ln(x, p["ln2_w"], p["ln2_b"])
    f = jnp.maximum(jnp.einsum("btc,cd->btd", h2.astype(jnp.bfloat16), p["w_ff1"],
                               preferred_element_type=jnp.float32) + p["b_ff1"], 0.0)
    f = jnp.einsum("btf,fc->btc", f.astype(jnp.bfloat16), p["w_ff2"],
                   preferred_element_type=jnp.float32) + p["b_ff2"]
    return x + f


if __name__ == "__main__":
    key = jax.random.PRNGKey(0)
    kx, kp = jax.random.split(key)
    x = jax.random.normal(kx, (B, T, C), jnp.float32)
    params = init_params(kp)

    out = jax.block_until_ready(decoder_forward(x, params))
    ref = decoder_reference(x, params)

    assert out.shape == (B, T, C)
    assert jnp.allclose(out, ref, atol=1e-2, rtol=1e-2), "kernel/reference mismatch"

    print("KERNEL_OK")
</pallas_src>

<mosaic_0001>
module attributes {stable_mosaic.version = 11 : i64} {
  func.func @decoder_kernel(%arg0: memref<16x32xf32, #tpu.memory_space<vmem>>, %arg1: memref<1x32xf32, #tpu.memory_space<vmem>>, %arg2: memref<1x32xf32, #tpu.memory_space<vmem>>, %arg3: memref<32x96xbf16, #tpu.memory_space<vmem>>, %arg4: memref<1x96xf32, #tpu.memory_space<vmem>>, %arg5: memref<32x32xbf16, #tpu.memory_space<vmem>>, %arg6: memref<1x32xf32, #tpu.memory_space<vmem>>, %arg7: memref<1x32xf32, #tpu.memory_space<vmem>>, %arg8: memref<1x32xf32, #tpu.memory_space<vmem>>, %arg9: memref<32x64xbf16, #tpu.memory_space<vmem>>, %arg10: memref<1x64xf32, #tpu.memory_space<vmem>>, %arg11: memref<64x32xbf16, #tpu.memory_space<vmem>>, %arg12: memref<1x32xf32, #tpu.memory_space<vmem>>, %arg13: memref<4x128xf32, #tpu.memory_space<vmem>>) attributes {dimension_semantics = [], scalar_prefetch = 0 : i64, scratch_operands = 0 : i64, tpu.core_type = #tpu.core_type<tc>} {
    %c0 = arith.constant 0 : index
    %c0_0 = arith.constant 0 : index
    %0 = vector.load %arg0[%c0, %c0_0] : memref<16x32xf32, #tpu.memory_space<vmem>>, vector<16x32xf32>
    %c0_1 = arith.constant 0 : index
    %c0_2 = arith.constant 0 : index
    %1 = vector.load %arg1[%c0_1, %c0_2] : memref<1x32xf32, #tpu.memory_space<vmem>>, vector<1x32xf32>
    %c0_3 = arith.constant 0 : index
    %c0_4 = arith.constant 0 : index
    %2 = vector.load %arg2[%c0_3, %c0_4] : memref<1x32xf32, #tpu.memory_space<vmem>>, vector<1x32xf32>
    %cst = arith.constant dense<0.000000e+00> : vector<16xf32>
    %3 = vector.multi_reduction <add>, %0, %cst [1] : vector<16x32xf32> to vector<16xf32>
    %4 = vector.shape_cast %3 : vector<16xf32> to vector<16x1xf32>
    %cst_5 = arith.constant 3.200000e+01 : f32
    %5 = vector.broadcast %cst_5 : f32 to vector<16x1xf32>
    %6 = arith.divf %4, %5 : vector<16x1xf32>
    %7 = vector.broadcast %6 : vector<16x1xf32> to vector<16x32xf32>
    %8 = arith.subf %0, %7 : vector<16x32xf32>
    %9 = arith.mulf %8, %8 : vector<16x32xf32>
    %cst_6 = arith.constant dense<0.000000e+00> : vector<16xf32>
    %10 = vector.multi_reduction <add>, %9, %cst_6 [1] : vector<16x32xf32> to vector<16xf32>
    %11 = vector.shape_cast %10 : vector<16xf32> to vector<16x1xf32>
    %cst_7 = arith.constant 3.200000e+01 : f32
    %12 = vector.broadcast %cst_7 : f32 to vector<16x1xf32>
    %13 = arith.divf %11, %12 : vector<16x1xf32>
    %14 = vector.broadcast %6 : vector<16x1xf32> to vector<16x32xf32>
    %15 = arith.subf %0, %14 : vector<16x32xf32>
    %cst_8 = arith.constant 9.99999974E-6 : f32
    %16 = vector.broadcast %cst_8 : f32 to vector<16x1xf32>
    %17 = arith.addf %13, %16 : vector<16x1xf32>
    %18 = math.rsqrt %17 : vector<16x1xf32>
    %19 = vector.broadcast %18 : vector<16x1xf32> to vector<16x32xf32>
    %20 = arith.mulf %15, %19 : vector<16x32xf32>
    %21 = vector.broadcast %1 : vector<1x32xf32> to vector<16x32xf32>
    %22 = arith.mulf %20, %21 : vector<16x32xf32>
    %23 = vector.broadcast %2 : vector<1x32xf32> to vector<16x32xf32>
    %24 = arith.addf %22, %23 : vector<16x32xf32>
    %25 = arith.truncf %24 : vector<16x32xf32> to vector<16x32xbf16>
    %c0_9 = arith.constant 0 : index
    %c0_10 = arith.constant 0 : index
    %26 = vector.load %arg3[%c0_9, %c0_10] : memref<32x96xbf16, #tpu.memory_space<vmem>>, vector<32x96xbf16>
    %cst_11 = arith.constant dense<0.000000e+00> : vector<16x96xf32>
    %27 = tpu.matmul %25, %26, %cst_11 {dimension_numbers = #tpu.dot_dimension_numbers<[1], [0], [0], [1], [0, 0, 1, 1], [], []>} : vector<16x32xbf16>, vector<32x96xbf16>, vector<16x96xf32> -> vector<16x96xf32>
    %c0_12 = arith.constant 0 : index
    %c0_13 = arith.constant 0 : index
    %28 = vector.load %arg4[%c0_12, %c0_13] : memref<1x96xf32, #tpu.memory_space<vmem>>, vector<1x96xf32>
    %29 = vector.broadcast %28 : vector<1x96xf32> to vector<16x96xf32>
    %30 = arith.addf %27, %29 : vector<16x96xf32>
    %31 = vector.extract_strided_slice %30 {offsets = [0, 0], sizes = [16, 8], strides = [1, 1]} : vector<16x96xf32> to vector<16x8xf32>
    %32 = vector.extract_strided_slice %30 {offsets = [0, 8], sizes = [16, 8], strides = [1, 1]} : vector<16x96xf32> to vector<16x8xf32>
    %33 = vector.extract_strided_slice %30 {offsets = [0, 16], sizes = [16, 8], strides = [1, 1]} : vector<16x96xf32> to vector<16x8xf32>
    %34 = vector.extract_strided_slice %30 {offsets = [0, 24], sizes = [16, 8], strides = [1, 1]} : vector<16x96xf32> to vector<16x8xf32>
    %35 = tpu.concatenate %31, %32, %33, %34 in 0 : vector<16x8xf32>, vector<16x8xf32>, vector<16x8xf32>, vector<16x8xf32> -> vector<64x8xf32>
    %36 = vector.extract_strided_slice %30 {offsets = [0, 32], sizes = [16, 8], strides = [1, 1]} : vector<16x96xf32> to vector<16x8xf32>
    %37 = vector.extract_strided_slice %30 {offsets = [0, 40], sizes = [16, 8], strides = [1, 1]} : vector<16x96xf32> to vector<16x8xf32>
    %38 = vector.extract_strided_slice %30 {offsets = [0, 48], sizes = [16, 8], strides = [1, 1]} : vector<16x96xf32> to vector<16x8xf32>
    %39 = vector.extract_strided_slice %30 {offsets = [0, 56], sizes = [16, 8], strides = [1, 1]} : vector<16x96xf32> to vector<16x8xf32>
    %40 = tpu.concatenate %36, %37, %38, %39 in 0 : vector<16x8xf32>, vector<16x8xf32>, vector<16x8xf32>, vector<16x8xf32> -> vector<64x8xf32>
    %41 = vector.extract_strided_slice %30 {offsets = [0, 64], sizes = [16, 8], strides = [1, 1]} : vector<16x96xf32> to vector<16x8xf32>
    %42 = vector.extract_strided_slice %30 {offsets = [0, 72], sizes = [16, 8], strides = [1, 1]} : vector<16x96xf32> to vector<16x8xf32>
    %43 = vector.extract_strided_slice %30 {offsets = [0, 80], sizes = [16, 8], strides = [1, 1]} : vector<16x96xf32> to vector<16x8xf32>
    %44 = vector.extract_strided_slice %30 {offsets = [0, 88], sizes = [16, 8], strides = [1, 1]} : vector<16x96xf32> to vector<16x8xf32>
    %45 = tpu.concatenate %41, %42, %43, %44 in 0 : vector<16x8xf32>, vector<16x8xf32>, vector<16x8xf32>, vector<16x8xf32> -> vector<64x8xf32>
    %cst_14 = arith.constant 0.353553385 : f32
    %46 = vector.broadcast %cst_14 : f32 to vector<64x8xf32>
    %47 = arith.mulf %35, %46 : vector<64x8xf32>
    %cst_15 = arith.constant dense<0.000000e+00> : vector<64x64xf32>
    %48 = tpu.matmul %47, %40, %cst_15 {dimension_numbers = #tpu.dot_dimension_numbers<[1], [1], [0], [0], [0, 0, 1, 0], [], []>} : vector<64x8xf32>, vector<64x8xf32>, vector<64x64xf32> -> vector<64x64xf32>
    %49 = tpu.iota {dimensions = array<i32: 0>} : vector<64x64xi32>
    %50 = tpu.iota {dimensions = array<i32: 1>} : vector<64x64xi32>
    %c3_i32 = arith.constant 3 : i32
    %51 = vector.broadcast %c3_i32 : i32 to vector<64x64xi32>
    %52 = arith.shrsi %49, %51 : vector<64x64xi32>
    %c3_i32_16 = arith.constant 3 : i32
    %53 = vector.broadcast %c3_i32_16 : i32 to vector<64x64xi32>
    %54 = arith.shrsi %50, %53 : vector<64x64xi32>
    %55 = arith.cmpi eq, %52, %54 : vector<64x64xi32>
    %56 = arith.cmpi sle, %50, %49 : vector<64x64xi32>
    %57 = arith.andi %55, %56 : vector<64x64xi1>
    %cst_17 = arith.constant -1.000000e+30 : f32
    %58 = vector.broadcast %cst_17 : f32 to vector<64x64xf32>
    %59 = arith.select %57, %48, %58 : vector<64x64xi1>, vector<64x64xf32>
    %cst_18 = arith.constant dense<0xFF800000> : vector<64xf32>
    %60 = vector.multi_reduction <maximumf>, %59, %cst_18 [1] : vector<64x64xf32> to vector<64xf32>
    %61 = vector.shape_cast %60 : vector<64xf32> to vector<64x1xf32>
    %62 = vector.broadcast %61 : vector<64x1xf32> to vector<64x64xf32>
    %63 = arith.subf %59, %62 : vector<64x64xf32>
    %64 = math.exp %63 : vector<64x64xf32>
    %cst_19 = arith.constant 0.000000e+00 : f32
    %65 = vector.broadcast %cst_19 : f32 to vector<64x64xf32>
    %66 = arith.select %57, %64, %65 : vector<64x64xi1>, vector<64x64xf32>
    %cst_20 = arith.constant dense<0.000000e+00> : vector<64xf32>
    %67 = vector.multi_reduction <add>, %66, %cst_20 [1] : vector<64x64xf32> to vector<64xf32>
    %68 = vector.shape_cast %67 : vector<64xf32> to vector<64x1xf32>
    %69 = tpu.reciprocal %68 {approx = true} : vector<64x1xf32> -> vector<64x1xf32>
    %70 = vector.broadcast %69 : vector<64x1xf32> to vector<64x64xf32>
    %71 = arith.mulf %66, %70 : vector<64x64xf32>
    %cst_21 = arith.constant dense<0.000000e+00> : vector<64x8xf32>
    %72 = tpu.matmul %71, %45, %cst_21 {dimension_numbers = #tpu.dot_dimension_numbers<[1], [0], [0], [1], [0, 0, 1, 1], [], []>} : vector<64x64xf32>, vector<64x8xf32>, vector<64x8xf32> -> vector<64x8xf32>
    %73 = vector.extract_strided_slice %72 {offsets = [0, 0], sizes = [16, 8], strides = [1, 1]} : vector<64x8xf32> to vector<16x8xf32>
    %74 = vector.extract_strided_slice %72 {offsets = [16, 0], sizes = [16, 8], strides = [1, 1]} : vector<64x8xf32> to vector<16x8xf32>
    %75 = vector.extract_strided_slice %72 {offsets = [32, 0], sizes = [16, 8], strides = [1, 1]} : vector<64x8xf32> to vector<16x8xf32>
    %76 = vector.extract_strided_slice %72 {offsets = [48, 0], sizes = [16, 8], strides = [1, 1]} : vector<64x8xf32> to vector<16x8xf32>
    %77 = tpu.concatenate %73, %74, %75, %76 in 1 : vector<16x8xf32>, vector<16x8xf32>, vector<16x8xf32>, vector<16x8xf32> -> vector<16x32xf32>
    %78 = arith.truncf %77 : vector<16x32xf32> to vector<16x32xbf16>
    %c0_22 = arith.constant 0 : index
    %c0_23 = arith.constant 0 : index
    %79 = vector.load %arg5[%c0_22, %c0_23] : memref<32x32xbf16, #tpu.memory_space<vmem>>, vector<32x32xbf16>
    %cst_24 = arith.constant dense<0.000000e+00> : vector<16x32xf32>
    %80 = tpu.matmul %78, %79, %cst_24 {dimension_numbers = #tpu.dot_dimension_numbers<[1], [0], [0], [1], [0, 0, 1, 1], [], []>} : vector<16x32xbf16>, vector<32x32xbf16>, vector<16x32xf32> -> vector<16x32xf32>
    %c0_25 = arith.constant 0 : index
    %c0_26 = arith.constant 0 : index
    %81 = vector.load %arg6[%c0_25, %c0_26] : memref<1x32xf32, #tpu.memory_space<vmem>>, vector<1x32xf32>
    %82 = vector.broadcast %81 : vector<1x32xf32> to vector<16x32xf32>
    %83 = arith.addf %80, %82 : vector<16x32xf32>
    %84 = arith.addf %0, %83 : vector<16x32xf32>
    %c0_27 = arith.constant 0 : index
    %c0_28 = arith.constant 0 : index
    %85 = vector.load %arg7[%c0_27, %c0_28] : memref<1x32xf32, #tpu.memory_space<vmem>>, vector<1x32xf32>
    %c0_29 = arith.constant 0 : index
    %c0_30 = arith.constant 0 : index
    %86 = vector.load %arg8[%c0_29, %c0_30] : memref<1x32xf32, #tpu.memory_space<vmem>>, vector<1x32xf32>
    %cst_31 = arith.constant dense<0.000000e+00> : vector<16xf32>
    %87 = vector.multi_reduction <add>, %84, %cst_31 [1] : vector<16x32xf32> to vector<16xf32>
    %88 = vector.shape_cast %87 : vector<16xf32> to vector<16x1xf32>
    %cst_32 = arith.constant 3.200000e+01 : f32
    %89 = vector.broadcast %cst_32 : f32 to vector<16x1xf32>
    %90 = arith.divf %88, %89 : vector<16x1xf32>
    %91 = vector.broadcast %90 : vector<16x1xf32> to vector<16x32xf32>
    %92 = arith.subf %84, %91 : vector<16x32xf32>
    %93 = arith.mulf %92, %92 : vector<16x32xf32>
    %cst_33 = arith.constant dense<0.000000e+00> : vector<16xf32>
    %94 = vector.multi_reduction <add>, %93, %cst_33 [1] : vector<16x32xf32> to vector<16xf32>
    %95 = vector.shape_cast %94 : vector<16xf32> to vector<16x1xf32>
    %cst_34 = arith.constant 3.200000e+01 : f32
    %96 = vector.broadcast %cst_34 : f32 to vector<16x1xf32>
    %97 = arith.divf %95, %96 : vector<16x1xf32>
    %98 = vector.broadcast %90 : vector<16x1xf32> to vector<16x32xf32>
    %99 = arith.subf %84, %98 : vector<16x32xf32>
    %cst_35 = arith.constant 9.99999974E-6 : f32
    %100 = vector.broadcast %cst_35 : f32 to vector<16x1xf32>
    %101 = arith.addf %97, %100 : vector<16x1xf32>
    %102 = math.rsqrt %101 : vector<16x1xf32>
    %103 = vector.broadcast %102 : vector<16x1xf32> to vector<16x32xf32>
    %104 = arith.mulf %99, %103 : vector<16x32xf32>
    %105 = vector.broadcast %85 : vector<1x32xf32> to vector<16x32xf32>
    %106 = arith.mulf %104, %105 : vector<16x32xf32>
    %107 = vector.broadcast %86 : vector<1x32xf32> to vector<16x32xf32>
    %108 = arith.addf %106, %107 : vector<16x32xf32>
    %109 = arith.truncf %108 : vector<16x32xf32> to vector<16x32xbf16>
    %c0_36 = arith.constant 0 : index
    %c0_37 = arith.constant 0 : index
    %110 = vector.load %arg9[%c0_36, %c0_37] : memref<32x64xbf16, #tpu.memory_space<vmem>>, vector<32x64xbf16>
    %cst_38 = arith.constant dense<0.000000e+00> : vector<16x64xf32>
    %111 = tpu.matmul %109, %110, %cst_38 {dimension_numbers = #tpu.dot_dimension_numbers<[1], [0], [0], [1], [0, 0, 1, 1], [], []>} : vector<16x32xbf16>, vector<32x64xbf16>, vector<16x64xf32> -> vector<16x64xf32>
    %c0_39 = arith.constant 0 : index
    %c0_40 = arith.constant 0 : index
    %112 = vector.load %arg10[%c0_39, %c0_40] : memref<1x64xf32, #tpu.memory_space<vmem>>, vector<1x64xf32>
    %113 = vector.broadcast %112 : vector<1x64xf32> to vector<16x64xf32>
    %114 = arith.addf %111, %113 : vector<16x64xf32>
    %cst_41 = arith.constant 0.000000e+00 : f32
    %115 = vector.broadcast %cst_41 : f32 to vector<16x64xf32>
    %116 = arith.maximumf %114, %115 : vector<16x64xf32>
    %117 = arith.truncf %116 : vector<16x64xf32> to vector<16x64xbf16>
    %c0_42 = arith.constant 0 : index
    %c0_43 = arith.constant 0 : index
    %118 = vector.load %arg11[%c0_42, %c0_43] : memref<64x32xbf16, #tpu.memory_space<vmem>>, vector<64x32xbf16>
    %cst_44 = arith.constant dense<0.000000e+00> : vector<16x32xf32>
    %119 = tpu.matmul %117, %118, %cst_44 {dimension_numbers = #tpu.dot_dimension_numbers<[1], [0], [0], [1], [0, 0, 1, 1], [], []>} : vector<16x64xbf16>, vector<64x32xbf16>, vector<16x32xf32> -> vector<16x32xf32>
    %c0_45 = arith.constant 0 : index
    %c0_46 = arith.constant 0 : index
    %120 = vector.load %arg12[%c0_45, %c0_46] : memref<1x32xf32, #tpu.memory_space<vmem>>, vector<1x32xf32>
    %121 = vector.broadcast %120 : vector<1x32xf32> to vector<16x32xf32>
    %122 = arith.addf %119, %121 : vector<16x32xf32>
    %123 = arith.addf %84, %122 : vector<16x32xf32>
    %124 = vector.extract_strided_slice %123 {offsets = [0, 0], sizes = [4, 32], strides = [1, 1]} : vector<16x32xf32> to vector<4x32xf32>
    %125 = vector.extract_strided_slice %123 {offsets = [4, 0], sizes = [4, 32], strides = [1, 1]} : vector<16x32xf32> to vector<4x32xf32>
    %126 = vector.extract_strided_slice %123 {offsets = [8, 0], sizes = [4, 32], strides = [1, 1]} : vector<16x32xf32> to vector<4x32xf32>
    %127 = vector.extract_strided_slice %123 {offsets = [12, 0], sizes = [4, 32], strides = [1, 1]} : vector<16x32xf32> to vector<4x32xf32>
    %128 = tpu.concatenate %124, %125, %126, %127 in 1 : vector<4x32xf32>, vector<4x32xf32>, vector<4x32xf32>, vector<4x32xf32> -> vector<4x128xf32>
    %c0_47 = arith.constant 0 : index
    %c0_48 = arith.constant 0 : index
    %129 = vector.load %arg13[%c0_47, %c0_48] : memref<4x128xf32, #tpu.memory_space<vmem>>, vector<4x128xf32>
    tpu.vector_store %arg13[%c0_47, %c0_48], %128 {strides = array<i32>} : memref<4x128xf32, #tpu.memory_space<vmem>>, vector<4x128xf32>,
    return
  }
}

</mosaic_0001>

<bundles_post_ra>
// kernel: tpu_custom_call.1
= control target key start
LH: loop header
LB: loop body
LE: loop exit
PB: predicated region body
PF: predicated region fallthrough
CT: control target
= control target key end

     0   :  { %18 = vsyncpa [#allocation3], 0  ;;  %s1487_s0 = inlined_call_operand.vmem [shape: f32[16,32], index: 0, kind: input, shape index: {}]   ;;  %s1488_s1 = inlined_call_operand.hbm [shape: f32[1,32], index: 1, kind: input, shape index: {}]   ;;  %s1489_s2 = inlined_call_operand.vmem [shape: f32[1,32], index: 2, kind: input, shape index: {}]   ;;  %s1490_s3 = inlined_call_operand.vmem [shape: bf16[32,96], index: 3, kind: input, shape index: {}]   ;;  %s1491_s4 = inlined_call_operand.vmem [shape: f32[1,96], index: 4, kind: input, shape index: {}]   ;;  %s1492_s5 = inlined_call_operand.vmem [shape: bf16[32,32], index: 5, kind: input, shape index: {}]   ;;  %s1493_s6 = inlined_call_operand.vmem [shape: f32[1,32], index: 6, kind: input, shape index: {}]   ;;  %s1494_s7 = inlined_call_operand.vmem [shape: f32[1,32], index: 7, kind: input, shape index: {}]   ;;  %s1495_s8 = inlined_call_operand.vmem [shape: f32[1,32], index: 8, kind: input, shape index: {}]   ;;  %s1496_s9 = inlined_call_operand.hbm [shape: bf16[32,64], index: 9, kind: input, shape index: {}]   ;;  %s1497_s10 = inlined_call_operand.vmem [shape: f32[1,64], index: 10, kind: input, shape index: {}]   ;;  %s1498_s11 = inlined_call_operand.vmem [shape: bf16[64,32], index: 11, kind: input, shape index: {}]   ;;  %s1499_s12 = inlined_call_operand.vmem [shape: f32[1,32], index: 12, kind: input, shape index: {}]   ;;  %s1500_s13 = inlined_call_operand.hbm [shape: f32[4,128], index: 13, kind: output, shape index: {}]  }
   0x1   :  { %19 = vsyncpa [#allocation6], 0 }
   0x2   :  { %20 = vsyncpa [#allocation4], 0  ;;  %s28_s27 = sshll.u32 %s1488_s1, 4  ;;  %s1075_s28 = smov [#allocation2]   ;;  %s29_s27 = int_to_ptr.hbm [resolvable:$true] %s28_s27 }
   0x3   :  { %s30_s29 = sshll.u32 %s1075_s28, 4  ;;  %s52_s15 = sshll.u32 %s1496_s9, 4  ;;  %s31_s29 = int_to_ptr.vmem [resolvable:$true] %s30_s29  ;;  %s53_s15 = int_to_ptr.hbm [resolvable:$true] %s52_s15 }
   0x4   :  { %33 = dma.hbm_to_vmem [thread:$0]  %s29_s27, 16, %s31_s29, [#allocation3]  }
   0x5   :  { %s1076_s16 = smov [#allocation5]   ;;  %s1077_s18 = smov 64  }
   0x6   :  { %s54_s17 = sshll.u32 %s1076_s16, 4  ;;  %s1078_s19 = smov 4   ;;  %s55_s17 = int_to_ptr.vmem [resolvable:$true] %s54_s17 }
   0x7   :  { %60 = dma.hbm_to_vmem [thread:$0]  %s53_s15, 256, %s55_s17, [#allocation6], %s1077_s18, %s1077_s18, %s1078_s19  }
   0x8   :  { %1069 = dma.done.wait [#allocation3], 16  }
   0x9   :  { %1070 = vsyncadd [#allocation3], 4294967280 }
   0xa   :  { %1071 = dma.done.wait [#allocation6], 256  }
   0xb   :  { %1072 = vsyncadd [#allocation6], 4294967040  ;;  %vm80_vm0 = vcmask 261120   ;;  %v1170_v0 = vld [vmem:[%s1487_s0] sm:$0xff]  ;;  %v1177_v2 = vld [vmem:[%s1487_s0 + $0x8] sm:$0xff]  ;;  %v1079_v4 = vmov 32.0  }
   0xc   :  { %v81_v1 = vsel %vm80_vm0, %v1170_v0, 0.0  ;;  %v84_v3 = vsel %vm80_vm0, %v1177_v2, 0.0  ;;  %955 = vrcp.f32 %v1079_v4  ;;  %v873_v21 = vld [vmem:[%s1490_s3 + $0x8] sm:$0xff]  ;;  %v872_v23 = vld [vmem:[%s1490_s3] sm:$0xff]  ;;  %s1080_s28 = smov 112   ;;  %s1082_s29 = smov 120  }
   0xd   :  { %82 = vadd.xlane.f32.xlu0 %v81_v1  ;;  %172 = vmatpush.bf16.msra.mxu0 %v873_v21  ;;  %v947_v42 = vld [vmem:[#allocation2] ss:$0 sm:$0xff]  ;;  %vm224_vm8 = vcmask 64512   ;;  %vm358_vm12 = vcmask 523264   ;;  %s1084_s30 = smov 8   ;;  %s1085_s14 = smov 16  }
   0xe   :  { %v948_v47 = vld [vmem:[%s1489_s2] ss:$0 sm:$0xff]  ;;  %s1081_s2 = smov 104   ;;  %s1086_s15 = smov 24  }
   0xf   :  { %v949_v52 = vld [vmem:[%s1491_s4] ss:$0 sm:$0xff]  ;;  %s1083_s4 = smov 96  }
  0x11   :  { %173 = vmatpush.bf16.msra.mxu0 %v872_v23 }
  0x12   :  { %v956_v5 = vpop.eup %955 }
  0x13   :  { %v88_v6 = vmul.f32 32.0, %v956_v5  ;;  %vm92_vm1 = vweird.f32 %v956_v5 }
  0x15   :  { %85 = vadd.xlane.f32.xlu0 %v84_v3  ;;  %v89_v7 = vsub.f32 1.0, %v88_v6 }
  0x17   :  { %v90_v8 = vmul.f32 %v956_v5, %v89_v7 }
  0x19   :  { %v91_v9 = vadd.f32 %v956_v5, %v90_v8 }
  0x1b   :  { %v1181_v10 = vsel %vm92_vm1, %v956_v5, %v91_v9 }
  0x80   :  { %v83_v11 = vpop.xlane.xlu0 %82 }
  0x81   :  { %v94_v12 = vmul.f32 %v1181_v10, %v83_v11 }
  0x83   :  { %v96_v13 = vsub.f32 %v1170_v0, %v94_v12 }
  0x85   :  { %v98_v14 = vmul.f32 %v96_v13, %v96_v13 }
  0x87   :  { %v100_v15 = vsel %vm80_vm0, %v98_v14, 0.0 }
  0x88   :  { %101 = vadd.xlane.f32.xlu1 %v100_v15  ;;  %v86_v16 = vpop.xlane.xlu0 %85 }
  0x89   :  { %v95_v17 = vmul.f32 %v1181_v10, %v86_v16 }
  0x8b   :  { %v97_v18 = vsub.f32 %v1177_v2, %v95_v17 }
  0x8d   :  { %v99_v19 = vmul.f32 %v97_v18, %v97_v18 }
  0x8f   :  { %v103_v20 = vsel %vm80_vm0, %v99_v19, 0.0 }
  0x90   :  { %104 = vadd.xlane.f32.xlu1 %v103_v20 }
  0xfb   :  { %v102_v22 = vpop.xlane.xlu1 %101 }
  0xfc   :  { %v106_v24 = vmul.f32 %v102_v22, %v1181_v10  ;;  %v306_v22 = vlaneseq }
  0xfe   :  { %v108_v25 = vadd.f32 1e-05, %v106_v24  ;;  %v1272_v23 = vand.u32 127, %v306_v22  ;;  %v307_v24 = vshrl.u32 %v306_v22, 7 }
 0x100   :  { %957 = vrsqrt.f32 %v108_v25  ;;  %vm116_vm3 = vweird.f32 %v108_v25  ;;  %vm334_vm10 = vcmp.le.s32.totalorder %v1272_v23, %v307_v24 }
 0x103   :  { %v105_v26 = vpop.xlane.xlu1 %104 }
 0x104   :  { %v107_v27 = vmul.f32 %v105_v26, %v1181_v10  ;;  %v1275_v26 = vshra.s32 %v1272_v23, 3 }
 0x106   :  { %v958_v28 = vpop.eup %957  ;;  %v109_v29 = vadd.f32 1e-05, %v107_v27  ;;  %v310_v27 = vadd.s32 24, %v307_v24 }
 0x107   :  { %v111_v30 = vmul.f32 %v958_v28, %v108_v25  ;;  %vm117_vm2 = vweird.f32 %v958_v28  ;;  %v317_v25 = vshra.s32 %v307_v24, 3 }
 0x108   :  { %959 = vrsqrt.f32 %v109_v29  ;;  %vm118_vm4 = vmor %vm116_vm3, %vm117_vm2  ;;  %vm126_vm6 = vweird.f32 %v109_v29  ;;  %vm337_vm14 = vcmp.le.s32.totalorder %v1272_v23, %v310_v27 }
 0x109   :  { %v112_v31 = vmul.f32 %v958_v28, %v111_v30  ;;  %vm326_vm9 = vcmp.eq.s32.totalorder %v317_v25, %v1275_v26 }
 0x10a   :  { %vm1279_vm11 = vmand %vm326_vm9, %vm334_vm10 }
 0x10b   :  { %v113_v32 = vmul.f32 0.5, %v112_v31 }
 0x10d   :  { %v114_v33 = vsub.f32 1.5, %v113_v32 }
 0x10e   :  { %v960_v34 = vpop.eup %959 }
 0x10f   :  { %v115_v35 = vmul.f32 %v958_v28, %v114_v33  ;;  %v121_v36 = vmul.f32 %v960_v34, %v109_v29  ;;  %vm127_vm5 = vweird.f32 %v960_v34  ;;  %v320_v29 = vshra.s32 %v310_v27, 3 }
 0x110   :  { %vm128_vm7 = vmor %vm126_vm6, %vm127_vm5 }
 0x111   :  { %v122_v37 = vmul.f32 %v960_v34, %v121_v36  ;;  %v119_v38 = vsel %vm118_vm4, %v958_v28, %v115_v35  ;;  %v308_v28 = vadd.s32 8, %v307_v24  ;;  %vm329_vm13 = vcmp.eq.s32.totalorder %v320_v29, %v1275_v26 }
 0x112   :  { %v130_v41 = vmul.f32 %v119_v38, %v96_v13  ;;  %v311_v35 = vadd.s32 32, %v307_v24  ;;  %vm1293_vm2 = vmand %vm329_vm13, %vm337_vm14 }
 0x113   :  { %v123_v39 = vmul.f32 0.5, %v122_v37  ;;  %v318_v31 = vshra.s32 %v308_v28, 3  ;;  %vm335_vm1 = vcmp.le.s32.totalorder %v1272_v23, %v308_v28  ;;  %v309_v37 = vadd.s32 16, %v307_v24 }
 0x114   :  { %v135_v46 = vmul.f32 %v947_v42, %v130_v41  ;;  %vm338_vm5 = vcmp.le.s32.totalorder %v1272_v23, %v311_v35 }
 0x115   :  { %v124_v40 = vsub.f32 1.5, %v123_v39  ;;  %vm327_vm15 = vcmp.eq.s32.totalorder %v318_v31, %v1275_v26  ;;  %v321_v39 = vshra.s32 %v311_v35, 3 }
 0x116   :  { %v140_v49 = vadd.f32 %v948_v47, %v135_v46  ;;  %vm1297_vm3 = vmand %vm327_vm15, %vm335_vm1  ;;  %v312_v46 = vadd.s32 40, %v307_v24 }
 0x117   :  { %v125_v43 = vmul.f32 %v960_v34, %v124_v40  ;;  %vm330_vm4 = vcmp.eq.s32.totalorder %v321_v39, %v1275_v26 }
 0x118   :  { %vm1314_vm9 = vmand %vm330_vm4, %vm338_vm5  ;;  %vm339_vm14 = vcmp.le.s32.totalorder %v1272_v23, %v312_v46 }
 0x119   :  { %v129_v44 = vsel %vm128_vm7, %v960_v34, %v125_v43  ;;  %vm336_vm7 = vcmp.le.s32.totalorder %v1272_v23, %v309_v37 }
 0x11a   :  { %v131_v45 = vmul.f32 %v129_v44, %v97_v18 }
 0x11c   :  { %v136_v48 = vmul.f32 %v947_v42, %v131_v45  ;;  %v319_v42 = vshra.s32 %v309_v37, 3 }
 0x11e   :  { %v141_v50 = vadd.f32 %v948_v47, %v136_v48  ;;  %vm328_vm6 = vcmp.eq.s32.totalorder %v319_v42, %v1275_v26 }
 0x11f   :  { %vm1318_vm10 = vmand %vm328_vm6, %vm336_vm7 }
 0x120   :  { %v142_v51 = vpack.c.bf16 %v141_v50, %v140_v49  ;;  %v313_v49 = vadd.s32 48, %v307_v24 }
 0x122   :  { %812 = vmatmul.msk.bf16.vlgmr.msra.gmra.mxu0 %vm80_vm0, %v142_v51  ;;  %v322_v51 = vshra.s32 %v312_v46, 3  ;;  %vm340_vm1 = vcmp.le.s32.totalorder %v1272_v23, %v313_v49 }
 0x124   :  { %vm331_vm13 = vcmp.eq.s32.totalorder %v322_v51, %v1275_v26 }
 0x125   :  { %vm1332_vm4 = vmand %vm331_vm13, %vm339_vm14 }
 0x19f   :  { %v175_v53 = vpop.f32.mrf.mxu0 }
 0x1a0   :  { %v1204_v54 = vadd.f32 %v949_v52, %v175_v53 }
 0x1a2   :  { %188 = vrot.lane.b32.xlu1 %v1204_v54, %s1080_s28  ;;  %v200_v14 = vmul.f32 0.35355338, %v1204_v54 }
 0x1a7   :  { %v177_v55 = vpop.f32.mrf.mxu0 }
 0x1a8   :  { %v1207_v56 = vadd.f32 %v949_v52, %v177_v55  ;;  %v323_v55 = vshra.s32 %v313_v49, 3 }
 0x1aa   :  { %190 = vrot.lane.b32.xlu0 %v1207_v56, %s1080_s28  ;;  %196 = vrot.lane.b32.xlu2 %v1207_v56, %s1081_s2  ;;  %v201_v17 = vmul.f32 0.35355338, %v1207_v56  ;;  %vm332_vm15 = vcmp.eq.s32.totalorder %v323_v55, %v1275_v26 }
 0x1ab   :  { %vm1336_vm5 = vmand %vm332_vm15, %vm340_vm1  ;;  %vm783_vm1 = vcmask 785408  }
 0x1b2   :  { %194 = vrot.lane.b32.xlu2 %v1204_v54, %s1081_s2 }
 0x1ba   :  { %184 = vrot.lane.b32.xlu2 %v1207_v56, %s1082_s29 }
 0x1c2   :  { %182 = vrot.lane.b32.xlu2 %v1204_v54, %s1082_s29 }
 0x204   :  { %v1214_v57 = vpop.permute.xlu2 %196 }
 0x205   :  { %222 = vrot.lane.b32.xlu2 %v1214_v57, %s1083_s4  ;;  %v207_v21 = vmul.f32 0.35355338, %v1214_v57 }
 0x20c   :  { %v195_v58 = vpop.permute.xlu2 %194 }
 0x20d   :  { %220 = vrot.lane.b32.xlu0 %v195_v58, %s1083_s4  ;;  %v912_v63 = vpack.i.bf16 %v195_v58, %v1214_v57  ;;  %v206_v20 = vmul.f32 0.35355338, %v195_v58 }
 0x214   :  { %v1219_v59 = vpop.permute.xlu1 %188  ;;  %v1221_v60 = vpop.permute.xlu2 %184 }
 0x215   :  { %216 = vrot.lane.b32.xlu1 %v1219_v59, %s1083_s4  ;;  %214 = vrot.lane.b32.xlu0 %v1221_v60, %s1083_s4  ;;  %v203_v13 = vmul.f32 0.35355338, %v1221_v60  ;;  %v204_v16 = vmul.f32 0.35355338, %v1219_v59 }
 0x21c   :  { %v1227_v61 = vpop.permute.xlu0 %190  ;;  %v1235_v62 = vpop.permute.xlu2 %182 }
 0x21d   :  { %210 = vrot.lane.b32.xlu1 %v1207_v56, %s1083_s4  ;;  %218 = vrot.lane.b32.xlu2 %v1227_v61, %s1083_s4  ;;  %v205_v18 = vmul.f32 0.35355338, %v1227_v61  ;;  %v202_v19 = vmul.f32 0.35355338, %v1235_v62 }
 0x21e   :  { %208 = vrot.lane.b32.xlu0 %v1204_v54, %s1083_s4 }
 0x225   :  { %212 = vrot.lane.b32.xlu2 %v1235_v62, %s1083_s4 }
 0x226   :  { %913 = vrot.lane.b32.xlu0 %v912_v63, %s1077_s18 }
 0x25f   :  { %v223_v1 = vpop.permute.xlu2 %222 }
 0x260   :  { %813 = vmatpush.xpose.msk.msrb.mxu0 %vm224_vm8, %v223_v1  ;;  %882 = vmatpush.xpose.msk.msra.mxu1 %vm224_vm8, %v223_v1 }
 0x277   :  { %v219_v4 = vpop.permute.xlu2 %218 }
 0x27f   :  { %v221_v3 = vpop.permute.xlu0 %220  ;;  %v213_v7 = vpop.permute.xlu2 %212 }
 0x280   :  { %814 = vmatpush.xpose.msk.msrb.mxu0 %vm224_vm8, %v221_v3  ;;  %883 = vmatpush.xpose.msk.msra.mxu1 %vm224_vm8, %v221_v3 }
 0x284   :  { %815 = vmatpush.xpose.msk.msrb.mxu0 %vm224_vm8, %v219_v4  ;;  %884 = vmatpush.xpose.msk.msra.mxu1 %vm224_vm8, %v219_v4  ;;  %v314_v4 = vadd.s32 56, %v307_v24 }
 0x286   :  { %vm341_vm7 = vcmp.le.s32.totalorder %v1272_v23, %v314_v4 }
 0x287   :  { %v217_v5 = vpop.permute.xlu1 %216  ;;  %v215_v6 = vpop.permute.xlu0 %214 }
 0x288   :  { %816 = vmatpush.xpose.msk.msrb.mxu0 %vm224_vm8, %v217_v5  ;;  %885 = vmatpush.xpose.msk.msra.mxu1 %vm224_vm8, %v217_v5 }
 0x28c   :  { %817 = vmatpush.xpose.msk.msrb.mxu0 %vm224_vm8, %v215_v6  ;;  %886 = vmatpush.xpose.msk.msra.mxu1 %vm224_vm8, %v215_v6 }
 0x28f   :  { %v211_v9 = vpop.permute.xlu1 %210 }
 0x290   :  { %v209_v8 = vpop.permute.xlu0 %208  ;;  %818 = vmatpush.xpose.msk.msrb.mxu0 %vm224_vm8, %v213_v7  ;;  %887 = vmatpush.xpose.msk.msra.mxu1 %vm224_vm8, %v213_v7 }
 0x294   :  { %819 = vmatpush.xpose.msk.msrb.mxu0 %vm224_vm8, %v211_v9  ;;  %888 = vmatpush.xpose.msk.msra.mxu1 %vm224_vm8, %v211_v9 }
 0x298   :  { %v914_v11 = vpop.permute.xlu0 %913  ;;  %820 = vmatpush.xpose.msk.msrb.mxu0 %vm224_vm8, %v209_v8  ;;  %889 = vmatpush.xpose.msk.msra.mxu1 %vm224_vm8, %v209_v8  ;;  %v324_v8 = vshra.s32 %v314_v4, 3 }
 0x299   :  { %v915_v12 = vunpack.i.l.bf16 %v914_v11  ;;  %v916_v15 = vunpack.i.h.bf16 %v914_v11 }
 0x29a   :  { %vm333_vm6 = vcmp.eq.s32.totalorder %v324_v8, %v1275_v26 }
 0x29b   :  { %511 = vmatpush.msra.mxu2 %v915_v12  ;;  %890 = vmatpush.msra.mxu3 %v915_v12  ;;  %vm1348_vm13 = vmand %vm333_vm6, %vm341_vm7 }
 0x29c   :  { %821 = vmatmul.msk.f32.vlgmr.msrb.gmra.mxu0 %vm224_vm8, %v200_v14  ;;  %824 = vmatmul.msk.f32.vlgmr.msra.gmra.mxu1 %vm224_vm8, %v203_v13 }
 0x29d   :  { %512 = vmatpush.msra.mxu2 %v916_v15  ;;  %891 = vmatpush.msra.mxu3 %v916_v15 }
 0x2a4   :  { %822 = vmatmul.msk.f32.gmra.mxu0 %vm224_vm8, %v201_v17  ;;  %825 = vmatmul.msk.f32.gmra.mxu1 %vm224_vm8, %v204_v16 }
 0x2ac   :  { %823 = vmatmul.msk.f32.gmra.mxu0 %vm224_vm8, %v202_v19  ;;  %826 = vmatmul.msk.f32.gmra.mxu1 %vm224_vm8, %v205_v18  ;;  %v927_v18 = vpack.i.bf16 %v1204_v54, %v1207_v56  ;;  %v917_v19 = vpack.i.bf16 %v1219_v59, %v1227_v61 }
 0x2b4   :  { %827 = vmatmul.msk.f32.gmra.mxu1 %vm224_vm8, %v206_v20 }
 0x2bc   :  { %828 = vmatmul.msk.f32.gmra.mxu1 %vm224_vm8, %v207_v21 }
 0x319   :  { %v282_v32 = vpop.f32.mrf.mxu0  ;;  %v291_v33 = vpop.f32.mrf.mxu1 }
 0x31a   :  { %v1285_v34 = vsel %vm1279_vm11, %v282_v32, -1e+30  ;;  %v1303_v41 = vsel %vm1293_vm2, %v291_v33, -1e+30 }
 0x31b   :  { %v359_v36 = vsel %vm358_vm12, %v1285_v34, -inf  ;;  %v368_v47 = vsel %vm358_vm12, %v1303_v41, -inf }
 0x31c   :  { %360 = vmax.xlane.f32.xlu2 %v359_v36 }
 0x321   :  { %v285_v43 = vpop.f32.mrf.mxu0  ;;  %v294_v44 = vpop.f32.mrf.mxu1 }
 0x322   :  { %v351_v45 = vsel %vm1297_vm3, %v285_v43, -1e+30  ;;  %v354_v53 = vsel %vm1314_vm9, %v294_v44, -1e+30 }
 0x323   :  { %v362_v48 = vsel %vm358_vm12, %v351_v45, -inf  ;;  %v371_v1 = vsel %vm358_vm12, %v354_v53, -inf }
 0x324   :  { %369 = vmax.xlane.f32.xlu2 %v368_v47  ;;  %363 = vmax.xlane.f32.xlu1 %v362_v48 }
 0x329   :  { %v288_v57 = vpop.f32.mrf.mxu0  ;;  %v297_v58 = vpop.f32.mrf.mxu1 }
 0x32a   :  { %v352_v63 = vsel %vm1318_vm10, %v288_v57, -1e+30  ;;  %v355_v7 = vsel %vm1332_vm4, %v297_v58, -1e+30 }
 0x32b   :  { %v365_v3 = vsel %vm358_vm12, %v352_v63, -inf  ;;  %v374_v13 = vsel %vm358_vm12, %v355_v7, -inf }
 0x32c   :  { %372 = vmax.xlane.f32.xlu1 %v371_v1  ;;  %366 = vmax.xlane.f32.xlu0 %v365_v3 }
 0x331   :  { %v300_v9 = vpop.f32.mrf.mxu1 }
 0x332   :  { %v356_v11 = vsel %vm1336_vm5, %v300_v9, -1e+30 }
 0x333   :  { %v377_v12 = vsel %vm358_vm12, %v356_v11, -inf }
 0x334   :  { %378 = vmax.xlane.f32.xlu2 %v377_v12  ;;  %375 = vmax.xlane.f32.xlu0 %v374_v13 }
 0x339   :  { %v303_v15 = vpop.f32.mrf.mxu1 }
 0x33a   :  { %v357_v16 = vsel %vm1348_vm13, %v303_v15, -1e+30 }
 0x33b   :  { %v380_v17 = vsel %vm358_vm12, %v357_v16, -inf }
 0x33c   :  { %381 = vmax.xlane.f32.xlu1 %v380_v17 }
 0x348   :  { %928 = vrot.lane.b32.xlu0 %v927_v18, %s1077_s18 }
 0x34c   :  { %918 = vrot.lane.b32.xlu2 %v917_v19, %s1077_s18 }
 0x38f   :  { %v361_v20 = vpop.xlane.xlu2 %360 }
 0x390   :  { %v383_v21 = vsub.f32 %v1285_v34, %v361_v20 }
 0x392   :  { %v391_v22 = vmul.f32 1.442695, %v383_v21 }
 0x394   :  { %961 = vpow2.f32 %v391_v22 }
 0x397   :  { %v364_v23 = vpop.xlane.xlu1 %363  ;;  %v370_v56 = vpop.xlane.xlu2 %369 }
 0x398   :  { %v384_v24 = vsub.f32 %v351_v45, %v364_v23  ;;  %v386_v5 = vsub.f32 %v1303_v41, %v370_v56 }
 0x39a   :  { %v962_v25 = vpop.eup %961  ;;  %v393_v26 = vmul.f32 1.442695, %v384_v24 }
 0x39b   :  { %v1364_v27 = vsel %vm1279_vm11, %v962_v25, 0.0  ;;  %vm570_vm11 = vcmask 130048  }
 0x39c   :  { %v415_v54 = vsel %vm358_vm12, %v1364_v27, 0.0  ;;  %963 = vpow2.f32 %v393_v26 }
 0x39d   :  { %416 = vadd.xlane.f32.xlu1 %v415_v54 }
 0x39f   :  { %v373_v59 = vpop.xlane.xlu1 %372  ;;  %v367_v61 = vpop.xlane.xlu0 %366 }
 0x3a0   :  { %v387_v28 = vsub.f32 %v354_v53, %v373_v59  ;;  %v385_v29 = vsub.f32 %v352_v63, %v367_v61 }
 0x3a2   :  { %v399_v31 = vmul.f32 1.442695, %v387_v28  ;;  %v395_v32 = vmul.f32 1.442695, %v385_v29  ;;  %v964_v33 = vpop.eup %963 }
 0x3a3   :  { %v1370_v34 = vsel %vm1297_vm3, %v964_v33, 0.0 }
 0x3a4   :  { %965 = vpow2.f32 %v399_v31  ;;  %v418_v30 = vsel %vm358_vm12, %v1370_v34, 0.0 }
 0x3a5   :  { %967 = vpow2.f32 %v395_v32  ;;  %419 = vadd.xlane.f32.xlu2 %v418_v30 }
 0x3a7   :  { %v379_v35 = vpop.xlane.xlu2 %378  ;;  %v376_v36 = vpop.xlane.xlu0 %375 }
 0x3a8   :  { %v389_v37 = vsub.f32 %v356_v11, %v379_v35  ;;  %v388_v39 = vsub.f32 %v355_v7, %v376_v36  ;;  %v922_v7 = vpack.i.bf16 %v1235_v62, %v1221_v60  ;;  %v397_v11 = vmul.f32 1.442695, %v386_v5 }
 0x3aa   :  { %v966_v42 = vpop.eup %965  ;;  %v403_v43 = vmul.f32 1.442695, %v389_v37  ;;  %v401_v44 = vmul.f32 1.442695, %v388_v39 }
 0x3ab   :  { %v968_v45 = vpop.eup %967  ;;  %v1376_v46 = vsel %vm1314_vm9, %v966_v42, 0.0 }
 0x3ac   :  { %969 = vpow2.f32 %v403_v43  ;;  %v427_v40 = vsel %vm358_vm12, %v1376_v46, 0.0  ;;  %v1382_v47 = vsel %vm1318_vm10, %v968_v45, 0.0 }
 0x3ad   :  { %971 = vpow2.f32 %v401_v44  ;;  %v421_v48 = vsel %vm358_vm12, %v1382_v47, 0.0  ;;  %428 = vadd.xlane.f32.xlu2 %v427_v40 }
 0x3ae   :  { %422 = vadd.xlane.f32.xlu0 %v421_v48 }
 0x3af   :  { %v919_v49 = vpop.permute.xlu2 %918  ;;  %v382_v51 = vpop.xlane.xlu1 %381 }
 0x3b0   :  { %v390_v53 = vsub.f32 %v357_v16, %v382_v51  ;;  %v920_v50 = vunpack.i.l.bf16 %v919_v49  ;;  %v921_v58 = vunpack.i.h.bf16 %v919_v49  ;;  %v875_v51 = vld [vmem:[%s1492_s5 + $0x8] sm:$0xff] }
 0x3b2   :  { %v970_v55 = vpop.eup %969  ;;  %v405_v57 = vmul.f32 1.442695, %v390_v53  ;;  %513 = vmatpush.msra.mxu2 %v920_v50  ;;  %892 = vmatpush.msra.mxu3 %v920_v50  ;;  %v874_v53 = vld [vmem:[%s1492_s5] sm:$0xff] }
 0x3b3   :  { %v972_v63 = vpop.eup %971  ;;  %v1388_v52 = vsel %vm1336_vm5, %v970_v55, 0.0 }
 0x3b4   :  { %973 = vpow2.f32 %v405_v57  ;;  %514 = vmatpush.msra.mxu2 %v921_v58  ;;  %893 = vmatpush.msra.mxu3 %v921_v58  ;;  %v433_v1 = vsel %vm358_vm12, %v1388_v52, 0.0  ;;  %v1394_v3 = vsel %vm1332_vm4, %v972_v63, 0.0 }
 0x3b5   :  { %v430_v4 = vsel %vm358_vm12, %v1394_v3, 0.0  ;;  %434 = vadd.xlane.f32.xlu2 %v433_v1  ;;  %975 = vpow2.f32 %v397_v11 }
 0x3b6   :  { %431 = vadd.xlane.f32.xlu0 %v430_v4  ;;  %923 = vrot.lane.b32.xlu1 %v922_v7, %s1077_s18 }
 0x3ba   :  { %v974_v6 = vpop.eup %973  ;;  %v929_v62 = vpop.permute.xlu0 %928 }
 0x3bb   :  { %v414_v8 = vsel %vm1348_vm13, %v974_v6, 0.0  ;;  %v976_v12 = vpop.eup %975  ;;  %v930_v21 = vunpack.i.l.bf16 %v929_v62  ;;  %v931_v38 = vunpack.i.h.bf16 %v929_v62 }
 0x3bc   :  { %v436_v9 = vsel %vm358_vm12, %v414_v8, 0.0  ;;  %v410_v13 = vsel %vm1293_vm2, %v976_v12, 0.0  ;;  %vm573_vm2 = vcmask 195584  }
 0x3bd   :  { %v424_v60 = vsel %vm358_vm12, %v410_v13, 0.0 }
 0x3be   :  { %437 = vadd.xlane.f32.xlu0 %v436_v9 }
 0x3e0   :  { %425 = vadd.xlane.f32.xlu1 %v424_v60 }
 0x410   :  { %v417_v15 = vpop.xlane.xlu1 %416 }
 0x411   :  { %977 = vrcp.f32 %v417_v15 }
 0x417   :  { %v978_v20 = vpop.eup %977 }
 0x418   :  { %v420_v41 = vpop.xlane.xlu2 %419  ;;  %v447_v22 = vmul.f32 %v978_v20, %v1364_v27 }
 0x419   :  { %979 = vrcp.f32 %v420_v41 }
 0x41f   :  { %v980_v24 = vpop.eup %979 }
 0x420   :  { %v448_v26 = vmul.f32 %v980_v24, %v1370_v34  ;;  %v429_v61 = vpop.xlane.xlu2 %428 }
 0x421   :  { %v423_v16 = vpop.xlane.xlu0 %422 }
 0x428   :  { %v924_v14 = vpop.permute.xlu1 %923  ;;  %v435_v33 = vpop.xlane.xlu2 %434 }
 0x429   :  { %v432_v17 = vpop.xlane.xlu0 %431  ;;  %v925_v18 = vunpack.i.l.bf16 %v924_v14  ;;  %v926_v19 = vunpack.i.h.bf16 %v924_v14 }
 0x42b   :  { %515 = vmatpush.msra.mxu2 %v925_v18  ;;  %894 = vmatpush.msra.mxu3 %v925_v18 }
 0x42d   :  { %516 = vmatpush.msra.mxu2 %v926_v19  ;;  %895 = vmatpush.msra.mxu3 %v926_v19 }
 0x42f   :  { %517 = vmatpush.msra.mxu2 %v930_v21  ;;  %896 = vmatpush.msra.mxu3 %v930_v21 }
 0x431   :  { %v438_v23 = vpop.xlane.xlu0 %437  ;;  %518 = vmatpush.msra.mxu2 %v931_v38  ;;  %897 = vmatpush.msra.mxu3 %v931_v38 }
 0x432   :  { %981 = vrcp.f32 %v438_v23  ;;  %829 = vmatmul.msk.f32.vlgmr.msra.gmra.mxu2 %vm358_vm12, %v447_v22 }
 0x433   :  { %983 = vrcp.f32 %v423_v16  ;;  %606 = vmatpush.bf16.msrb.mxu3 %v875_v51 }
 0x437   :  { %607 = vmatpush.bf16.msrb.mxu3 %v874_v53 }
 0x438   :  { %v982_v25 = vpop.eup %981 }
 0x439   :  { %v454_v54 = vmul.f32 %v982_v25, %v414_v8  ;;  %v984_v56 = vpop.eup %983 }
 0x43a   :  { %830 = vmatmul.msk.f32.gmra.mxu2 %vm358_vm12, %v448_v26  ;;  %v449_v59 = vmul.f32 %v984_v56, %v1382_v47  ;;  %v877_v26 = vld [vmem:[#allocation5 + $0x8] sm:$0xff] }
 0x43b   :  { %836 = vmatmul.msk.f32.vlgmr.msra.gmra.mxu3 %vm358_vm12, %v454_v54 }
 0x43c   :  { %702 = vmatpush.bf16.msra.mxu3 %v877_v26 }
 0x442   :  { %831 = vmatmul.msk.f32.gmra.mxu2 %vm358_vm12, %v449_v59 }
 0x453   :  { %v426_v27 = vpop.xlane.xlu1 %425 }
 0x454   :  { %985 = vrcp.f32 %v426_v27  ;;  %v876_v27 = vld [vmem:[#allocation5] sm:$0xff] }
 0x455   :  { %987 = vrcp.f32 %v429_v61  ;;  %703 = vmatpush.bf16.msra.mxu3 %v876_v27  ;;  %v881_v61 = vld [vmem:[%s1498_s11 + $0x18] sm:$0xff] }
 0x456   :  { %989 = vrcp.f32 %v432_v17 }
 0x457   :  { %991 = vrcp.f32 %v435_v33 }
 0x45a   :  { %v986_v28 = vpop.eup %985 }
 0x45b   :  { %v450_v29 = vmul.f32 %v986_v28, %v410_v13  ;;  %v988_v31 = vpop.eup %987  ;;  %v950_v13 = vld [vmem:[%s1493_s6] ss:$0 sm:$0xff] }
 0x45c   :  { %v451_v32 = vmul.f32 %v988_v31, %v1376_v46  ;;  %v990_v34 = vpop.eup %989 }
 0x45d   :  { %832 = vmatmul.msk.f32.gmra.mxu2 %vm358_vm12, %v450_v29  ;;  %v452_v30 = vmul.f32 %v990_v34, %v1394_v3  ;;  %v992_v35 = vpop.eup %991 }
 0x45e   :  { %v453_v36 = vmul.f32 %v992_v35, %v1388_v52 }
 0x465   :  { %833 = vmatmul.msk.f32.gmra.mxu2 %vm358_vm12, %v451_v32 }
 0x46d   :  { %834 = vmatmul.msk.f32.gmra.mxu2 %vm358_vm12, %v452_v30 }
 0x475   :  { %835 = vmatmul.msk.f32.gmra.mxu2 %vm358_vm12, %v453_v36 }
 0x4b5   :  { %v520_v37 = vpop.f32.mrf.mxu2 }
 0x4bd   :  { %v523_v39 = vpop.f32.mrf.mxu2 }
 0x4be   :  { %v541_v47 = vpop.f32.mrf.mxu3 }
 0x4c5   :  { %v526_v42 = vpop.f32.mrf.mxu2 }
 0x4e0   :  { %v529_v43 = vpop.f32.mrf.mxu2 }
 0x4e1   :  { %v932_v44 = vpack.i.bf16 %v529_v43, %v526_v42 }
 0x4e3   :  { %933 = vrot.lane.b32.xlu1 %v932_v44, %s1084_s30 }
 0x4e8   :  { %v532_v45 = vpop.f32.mrf.mxu2 }
 0x4f0   :  { %v535_v46 = vpop.f32.mrf.mxu2 }
 0x4f1   :  { %v937_v40 = vpack.i.bf16 %v535_v46, %v532_v45 }
 0x4f3   :  { %938 = vrot.lane.b32.xlu2 %v937_v40, %s1085_s14 }
 0x4f8   :  { %v538_v48 = vpop.f32.mrf.mxu2 }
 0x4f9   :  { %v942_v49 = vpack.i.bf16 %v541_v47, %v538_v48  ;;  %v952_v48 = vld [vmem:[%s1495_s8] ss:$0 sm:$0xff] }
 0x4fb   :  { %943 = vrot.lane.b32.xlu0 %v942_v49, %s1086_s15  ;;  %s793_s15 = sshll.u32 %s1500_s13, 4  ;;  %s794_s15 = int_to_ptr.hbm [resolvable:$true] %s793_s15 }
 0x54d   :  { %v939_v58 = vpop.permute.xlu2 %938 }
 0x54e   :  { %v941_v1 = vunpack.i.h.bf16 %v939_v58  ;;  %v940_v3 = vunpack.i.l.bf16 %v939_v58  ;;  %v880_v58 = vld [vmem:[%s1498_s11 + $0x10] sm:$0xff] }
 0x555   :  { %v934_v50 = vpop.permute.xlu1 %933 }
 0x556   :  { %v936_v55 = vunpack.i.h.bf16 %v934_v50  ;;  %v935_v57 = vunpack.i.l.bf16 %v934_v50 }
 0x558   :  { %v569_v63 = vsel %vm224_vm8, %v523_v39, %v936_v55  ;;  %v568_v52 = vsel %vm224_vm8, %v520_v37, %v935_v57 }
 0x559   :  { %v571_v8 = vsel %vm570_vm11, %v568_v52, %v940_v3  ;;  %v572_v9 = vsel %vm570_vm11, %v569_v63, %v941_v1  ;;  %v879_v63 = vld [vmem:[%s1498_s11 + $0x8] sm:$0xff]  ;;  %v878_v52 = vld [vmem:[%s1498_s11] sm:$0xff]  ;;  %s1087_s11 = smov 32  }
 0x55a   :  { %v953_v3 = vld [vmem:[%s1497_s10] ss:$0 sm:$0xff]  ;;  %s1088_s10 = smov [#allocation7]  }
 0x56d   :  { %v944_v4 = vpop.permute.xlu0 %943 }
 0x56e   :  { %v946_v7 = vunpack.i.h.bf16 %v944_v4  ;;  %v945_v6 = vunpack.i.l.bf16 %v944_v4 }
 0x570   :  { %v575_v5 = vsel %vm573_vm2, %v572_v9, %v946_v7  ;;  %v574_v11 = vsel %vm573_vm2, %v571_v8, %v945_v6 }
 0x571   :  { %v576_v12 = vpack.c.bf16 %v575_v5, %v574_v11  ;;  %v954_v11 = vld [vmem:[%s1499_s12] ss:$0 sm:$0xff]  ;;  %s791_s12 = sshll.u32 %s1088_s10, 4  ;;  %s792_s12 = int_to_ptr.vmem [resolvable:$true] %s791_s12 }
 0x573   :  { %845 = vmatmul.msk.bf16.vlgmr.msrb.gmra.mxu3 %vm80_vm0, %v576_v12 }
 0x574   :  { %756 = vmatpush.bf16.msrb.mxu3 %v881_v61 }
 0x578   :  { %757 = vmatpush.bf16.msrb.mxu3 %v880_v58 }
 0x57c   :  { %758 = vmatpush.bf16.msrb.mxu3 %v879_v63 }
 0x580   :  { %759 = vmatpush.bf16.msrb.mxu3 %v878_v52 }
 0x5f6   :  { %v609_v60 = vpop.f32.mrf.mxu3 }
 0x5f7   :  { %v610_v62 = vadd.f32 %v950_v13, %v609_v60 }
 0x5f9   :  { %v1435_v15 = vadd.f32 %v610_v62, %v1170_v0 }
 0x5fb   :  { %v618_v16 = vsel %vm80_vm0, %v1435_v15, 0.0 }
 0x5fc   :  { %619 = vadd.xlane.f32.xlu1 %v618_v16 }
 0x5fe   :  { %v611_v14 = vpop.f32.mrf.mxu3 }
 0x5ff   :  { %v612_v17 = vadd.f32 %v950_v13, %v611_v14 }
 0x601   :  { %v1440_v18 = vadd.f32 %v612_v17, %v1177_v2 }
 0x603   :  { %v621_v19 = vsel %vm80_vm0, %v1440_v18, 0.0 }
 0x604   :  { %622 = vadd.xlane.f32.xlu0 %v621_v19 }
 0x66f   :  { %v620_v41 = vpop.xlane.xlu1 %619 }
 0x670   :  { %v624_v20 = vmul.f32 %v620_v41, %v1181_v10 }
 0x672   :  { %v626_v21 = vsub.f32 %v1435_v15, %v624_v20 }
 0x674   :  { %v628_v0 = vmul.f32 %v626_v21, %v626_v21 }
 0x676   :  { %v630_v38 = vsel %vm80_vm0, %v628_v0, 0.0 }
 0x677   :  { %v623_v22 = vpop.xlane.xlu0 %622  ;;  %631 = vadd.xlane.f32.xlu2 %v630_v38 }
 0x678   :  { %v625_v23 = vmul.f32 %v623_v22, %v1181_v10 }
 0x67a   :  { %v627_v24 = vsub.f32 %v1440_v18, %v625_v23 }
 0x67c   :  { %v629_v2 = vmul.f32 %v627_v24, %v627_v24 }
 0x67e   :  { %v633_v25 = vsel %vm80_vm0, %v629_v2, 0.0 }
 0x67f   :  { %634 = vadd.xlane.f32.xlu1 %v633_v25 }
 0x6ea   :  { %v632_v54 = vpop.xlane.xlu2 %631 }
 0x6eb   :  { %v636_v56 = vmul.f32 %v632_v54, %v1181_v10 }
 0x6ed   :  { %v638_v59 = vadd.f32 1e-05, %v636_v56 }
 0x6ef   :  { %993 = vrsqrt.f32 %v638_v59  ;;  %vm646_vm3 = vweird.f32 %v638_v59 }
 0x6f2   :  { %v635_v28 = vpop.xlane.xlu1 %634 }
 0x6f3   :  { %v637_v29 = vmul.f32 %v635_v28, %v1181_v10  ;;  %v951_v10 = vld [vmem:[%s1494_s7] ss:$0 sm:$0xff] }
 0x6f5   :  { %v994_v31 = vpop.eup %993  ;;  %v639_v32 = vadd.f32 1e-05, %v637_v29 }
 0x6f6   :  { %v641_v33 = vmul.f32 %v994_v31, %v638_v59  ;;  %vm647_vm8 = vweird.f32 %v994_v31 }
 0x6f7   :  { %995 = vrsqrt.f32 %v639_v32  ;;  %vm648_vm9 = vmor %vm646_vm3, %vm647_vm8  ;;  %vm656_vm14 = vweird.f32 %v639_v32 }
 0x6f8   :  { %v642_v34 = vmul.f32 %v994_v31, %v641_v33 }
 0x6fa   :  { %v643_v30 = vmul.f32 0.5, %v642_v34 }
 0x6fc   :  { %v644_v35 = vsub.f32 1.5, %v643_v30 }
 0x6fd   :  { %v996_v36 = vpop.eup %995 }
 0x6fe   :  { %v645_v37 = vmul.f32 %v994_v31, %v644_v35  ;;  %v651_v39 = vmul.f32 %v996_v36, %v639_v32  ;;  %vm657_vm10 = vweird.f32 %v996_v36 }
 0x6ff   :  { %vm658_vm15 = vmor %vm656_vm14, %vm657_vm10 }
 0x700   :  { %v652_v42 = vmul.f32 %v996_v36, %v651_v39  ;;  %v649_v43 = vsel %vm648_vm9, %v994_v31, %v645_v37 }
 0x701   :  { %v660_v46 = vmul.f32 %v649_v43, %v626_v21 }
 0x702   :  { %v653_v44 = vmul.f32 0.5, %v652_v42 }
 0x703   :  { %v665_v49 = vmul.f32 %v951_v10, %v660_v46 }
 0x704   :  { %v654_v45 = vsub.f32 1.5, %v653_v44 }
 0x705   :  { %v670_v50 = vadd.f32 %v952_v48, %v665_v49 }
 0x706   :  { %v655_v40 = vmul.f32 %v996_v36, %v654_v45 }
 0x708   :  { %v659_v47 = vsel %vm658_vm15, %v996_v36, %v655_v40 }
 0x709   :  { %v661_v51 = vmul.f32 %v659_v47, %v627_v24 }
 0x70b   :  { %v666_v53 = vmul.f32 %v951_v10, %v661_v51 }
 0x70d   :  { %v671_v55 = vadd.f32 %v952_v48, %v666_v53 }
 0x70f   :  { %v672_v57 = vpack.c.bf16 %v671_v55, %v670_v50 }
 0x711   :  { %854 = vmatmul.msk.bf16.vlgmr.msra.gmra.mxu3 %vm80_vm0, %v672_v57 }
 0x794   :  { %v705_v1 = vpop.f32.mrf.mxu3 }
 0x795   :  { %v706_v4 = vadd.f32 %v953_v3, %v705_v1 }
 0x797   :  { %v710_v8 = vmax.f32 %v706_v4, 0.0 }
 0x79c   :  { %v707_v7 = vpop.f32.mrf.mxu3 }
 0x79d   :  { %v708_v6 = vadd.f32 %v953_v3, %v707_v7 }
 0x79f   :  { %v711_v9 = vmax.f32 %v708_v6, 0.0 }
 0x7a1   :  { %v712_v5 = vpack.c.bf16 %v711_v9, %v710_v8 }
 0x7a3   :  { %871 = vmatmul.msk.bf16.vlgmr.msrb.gmra.mxu3 %vm358_vm12, %v712_v5 }
 0x826   :  { %v761_v12 = vpop.f32.mrf.mxu3 }
 0x827   :  { %v762_v13 = vadd.f32 %v954_v11, %v761_v12 }
 0x829   :  { %v766_v60 = vadd.f32 %v762_v13, %v1435_v15 }
 0x82b   :  { %v769_v62 = vrot.slane %v766_v60, 4 }
 0x82d   :  { %770 = vrot.lane.b32.xlu0 %v769_v62, %s1087_s11 }
 0x82e   :  { %v763_v16 = vpop.f32.mrf.mxu3 }
 0x82f   :  { %v764_v14 = vadd.f32 %v954_v11, %v763_v16 }
 0x831   :  { %v767_v17 = vadd.f32 %v764_v14, %v1440_v18 }
 0x833   :  { %774 = vrot.lane.b32.xlu2 %v767_v17, %s1077_s18  ;;  %v777_v19 = vrot.slane %v767_v17, 4 }
 0x835   :  { %778 = vrot.lane.b32.xlu1 %v777_v19, %s1083_s4 }
 0x88d   :  { %v775_v15 = vpop.permute.xlu2 %774 }
 0x89f   :  { %v771_v41 = vpop.permute.xlu0 %770 }
 0x8a0   :  { %v781_v20 = vsel %vm80_vm0, %v766_v60, %v771_v41 }
 0x8a1   :  { %v782_v0 = vsel %vm358_vm12, %v781_v20, %v775_v15 }
 0x8a7   :  { %v779_v21 = vpop.permute.xlu1 %778 }
 0x8a8   :  { %v784_v18 = vsel %vm783_vm1, %v782_v0, %v779_v21 }
 0x8a9   :  { %785 = vst [vmem:[#allocation7] sm:$0xf] %v784_v18 }
 0x8aa   :  { %796 = dma.vmem_to_hbm [thread:$0]  %s792_s12, 64, %s794_s15, [#allocation4]  }
 0x8ab   :  { %1073 = dma.done.wait [#allocation4], 64  }
 0x8ac   :  { %1074 = vsyncadd [#allocation4], 4294967232 }
 0x8ad   :  { %801 = vsyncpa [#allocation3], 1 }
 0x8ae   :  { %802 = vsyncpa [#allocation6], 1 }
 0x8af   :  { %803 = vsyncpa [#allocation4], 1 }

</bundles_post_ra>
